<compile_context>
chip_gen: v7x
topology: tpu7x:2x2x1
jax: 0.10.0
libtpu: 0.0.40
codegen_flags: <defaults>
</compile_context>

<pallas_src>
import jax
import jax.numpy as jnp
from jax.experimental import pallas as pl
from jax.experimental.pallas import tpu as pltpu

EPS = 0.0003
H1, H2, H3 = 256, 128, 128


def _critic_kernel(
    s_ref, a_ref,                 # [TB, state_dim] f32, [TB, action_dim] f32
    w_s1_ref, b_s1_ref,           # [state_dim, 256] bf16, [1, 256] f32
    w_a1_ref, b_a1_ref,           # [action_dim, 128] bf16, [1, 128] f32
    w_s2_ref, b_s2_ref,           # [256, 128] bf16, [1, 128] f32
    w_f2_ref, b_f2_ref,           # [256, 128] bf16, [1, 128] f32
    w_f3_ref, b_f3_ref,           # [1, 128] f32, [1, 1] f32
    o_ref,                        # [TB, 1] f32
):
    # Layer 1: two independent MXU dots (state path, action path), f32
    # accumulation; bias-add + ReLU stay in f32 (v5e VPU has no bf16 VALU).
    s1 = jnp.maximum(
        jnp.dot(s_ref[...].astype(jnp.bfloat16), w_s1_ref[...],
                preferred_element_type=jnp.float32) + b_s1_ref[...], 0.0)
    a1 = jnp.maximum(
        jnp.dot(a_ref[...].astype(jnp.bfloat16), w_a1_ref[...],
                preferred_element_type=jnp.float32) + b_a1_ref[...], 0.0)

    # fcs2 + relu
    s2 = jnp.maximum(
        jnp.dot(s1.astype(jnp.bfloat16), w_s2_ref[...],
                preferred_element_type=jnp.float32) + b_s2_ref[...], 0.0)

    # fc2(cat(s2, a1)) + relu: lane-aligned (128|128) concat feeding a single
    # K=256 dot -- full MXU depth on v6e/v7x, no cross-lane shuffle.
    x_cat = jnp.concatenate(
        [s2.astype(jnp.bfloat16), a1.astype(jnp.bfloat16)], axis=1)
    x = jnp.maximum(
        jnp.dot(x_cat, w_f2_ref[...],
                preferred_element_type=jnp.float32) + b_f2_ref[...], 0.0)

    # fc3 (N=1): VPU multiply + XLU lane reduction instead of an MXU matmul.
    o_ref[...] = (
        jnp.sum(x * w_f3_ref[...], axis=-1, keepdims=True) + b_f3_ref[...]
    )


def prepare_params(params):
    """One-time host-side cast of matmul weights to bf16 (MXU-native)."""
    return {
        "w_s1": params["w_s1"].astype(jnp.bfloat16),
        "b_s1": params["b_s1"],
        "w_a1": params["w_a1"].astype(jnp.bfloat16),
        "b_a1": params["b_a1"],
        "w_s2": params["w_s2"].astype(jnp.bfloat16),
        "b_s2": params["b_s2"],
        "w_f2": params["w_f2"].astype(jnp.bfloat16),
        "b_f2": params["b_f2"],
        "w_f3": params["w_f3"].reshape(1, H3),   # f32 row vector for VPU fc3
        "b_f3": params["b_f3"],
    }


def critic_forward(state, action, kp, *, tb=None):
    """state: [B, state_dim], action: [B, action_dim] -> q: [B, 1]."""
    B, state_dim = state.shape
    action_dim = action.shape[1]

    state = state.astype(jnp.float32)
    action = action.astype(jnp.float32)

    # Sublane alignment only (<= 7 rows; no-op for typical batch sizes).
    b_pad = ((B + 7) // 8) * 8
    if b_pad != B:
        state = jnp.pad(state, ((0, b_pad - B), (0, 0)))
        action = jnp.pad(action, ((0, b_pad - B), (0, 0)))

    if tb is None:
        # Rough per-row working-set bytes (f32/bf16 activations + inputs) used
        # to cap tb; 12 MiB budget leaves headroom for double-buffered I/O and
        # resident weights inside the 32 MiB vmem limit on every generation.
        per_row = 8 * (state_dim + action_dim) + 6 * (H1 + 3 * H2) + 16
        cap = max(64, min(2048, (12 * 2 ** 20) // per_row))
        cap = (cap // 8) * 8
        # >= 2 grid steps once B >= 16 so v7x's two TensorCores both get work
        # under the "parallel" batch axis; 2 big steps beat many tiny ones
        # (per-step pipeline overhead ~0.35 us).
        tb = min(cap, max(8, ((pl.cdiv(b_pad, 2) + 7) // 8) * 8))
    n_blk = pl.cdiv(b_pad, tb)

    inputs = (
        state, action,
        kp["w_s1"], kp["b_s1"],
        kp["w_a1"], kp["b_a1"],
        kp["w_s2"], kp["b_s2"],
        kp["w_f2"], kp["b_f2"],
        kp["w_f3"], kp["b_f3"],
    )

    def resident(arr):
        # Whole array, same block index every grid step -> VMEM-resident;
        # Pallas skips re-DMA for unchanged blocks.
        return pl.BlockSpec(arr.shape, lambda i: (0, 0))

    in_specs = [
        pl.BlockSpec((tb, state_dim), lambda i: (i, 0)),
        pl.BlockSpec((tb, action_dim), lambda i: (i, 0)),
    ] + [resident(a) for a in inputs[2:]]
    out_specs = pl.BlockSpec((tb, 1), lambda i: (i, 0))

    flops = 2 * b_pad * (
        state_dim * H1 + action_dim * H2 + H1 * H2 + (H2 + H2) * H3 + H3)
    bytes_accessed = (
        int(state.size) * 4 + int(action.size) * 4
        + sum(int(a.size) * a.dtype.itemsize for a in inputs[2:])
        + b_pad * 4
    )

    q = pl.pallas_call(
        _critic_kernel,
        out_shape=jax.ShapeDtypeStruct((b_pad, 1), jnp.float32),
        grid=(n_blk,),
        in_specs=in_specs,
        out_specs=out_specs,
        compiler_params=pltpu.CompilerParams(
            dimension_semantics=("parallel",),
            vmem_limit_bytes=32 * 1024 * 1024,
        ),
        cost_estimate=pl.CostEstimate(
            flops=flops, transcendentals=0, bytes_accessed=bytes_accessed),
    )(*inputs)
    return q[:B] if b_pad != B else q


def init_params(key, state_dim, action_dim):
    """Deterministic synthetic init matching the module's shapes.

    Linears: fcs1 [state_dim->256], fcs2 [256->128], fca1 [action_dim->128],
    fc2 [256->128], fc3 [128->1]. Weights xavier-normal-like (fc3 uniform in
    [-EPS, EPS]); biases uniform(-1/sqrt(fan_in), ..). Stored as [in, out]
    (transposed vs. PyTorch).
    """
    ks = jax.random.split(key, 10)

    def xavier(k, fan_in, fan_out):
        std = (2.0 / (fan_in + fan_out)) ** 0.5
        return std * jax.random.normal(k, (fan_in, fan_out), dtype=jnp.float32)

    def bias(k, fan_in, fan_out):
        bound = 1.0 / (fan_in ** 0.5)
        return jax.random.uniform(
            k, (1, fan_out), minval=-bound, maxval=bound, dtype=jnp.float32)

    return {
        "w_s1": xavier(ks[0], state_dim, H1),
        "b_s1": bias(ks[1], state_dim, H1),
        "w_s2": xavier(ks[2], H1, H2),
        "b_s2": bias(ks[3], H1, H2),
        "w_a1": xavier(ks[4], action_dim, H2),
        "b_a1": bias(ks[5], action_dim, H2),
        "w_f2": xavier(ks[6], H2 + H2, H3),   # fc2 over concat(s2, a1)
        "b_f2": bias(ks[7], H2 + H2, H3),
        "w_f3": jax.random.uniform(
            ks[8], (H3, 1), minval=-EPS, maxval=EPS, dtype=jnp.float32),
        "b_f3": bias(ks[9], H3, 1),
    }


def critic_ref(state, action, params):
    """Plain-JAX f32 reference for correctness checking."""
    s1 = jax.nn.relu(state @ params["w_s1"] + params["b_s1"])
    s2 = jax.nn.relu(s1 @ params["w_s2"] + params["b_s2"])
    a1 = jax.nn.relu(action @ params["w_a1"] + params["b_a1"])
    x = jnp.concatenate([s2, a1], axis=1)
    x = jax.nn.relu(x @ params["w_f2"] + params["b_f2"])
    return x @ params["w_f3"] + params["b_f3"]


if __name__ == "__main__":
    key = jax.random.PRNGKey(0)
    k_s, k_a, k_p = jax.random.split(key, 3)

    batch, state_dim, action_dim = 8, 16, 4
    state = jax.random.normal(k_s, (batch, state_dim), dtype=jnp.float32)
    action = jax.random.normal(k_a, (batch, action_dim), dtype=jnp.float32)
    params = init_params(k_p, state_dim, action_dim)
    kparams = prepare_params(params)

    q = critic_forward(state, action, kparams)
    jax.block_until_ready(q)

    q_ref = critic_ref(state, action, params)
    assert q.shape == (batch, 1)
    # bf16 matmul operands (f32 accumulate) -> slightly looser tolerance.
    assert jnp.allclose(q, q_ref, atol=2e-3, rtol=2e-2), "mismatch vs reference"

    print("KERNEL_OK")
</pallas_src>

<mosaic_0001>
module attributes {stable_mosaic.version = 11 : i64} {
  func.func @_critic_kernel(%arg0: i32, %arg1: memref<8x16xf32, #tpu.memory_space<vmem>>, %arg2: memref<8x4xf32, #tpu.memory_space<vmem>>, %arg3: memref<16x256xbf16, #tpu.memory_space<vmem>>, %arg4: memref<1x256xf32, #tpu.memory_space<vmem>>, %arg5: memref<4x128xbf16, #tpu.memory_space<vmem>>, %arg6: memref<1x128xf32, #tpu.memory_space<vmem>>, %arg7: memref<256x128xbf16, #tpu.memory_space<vmem>>, %arg8: memref<1x128xf32, #tpu.memory_space<vmem>>, %arg9: memref<256x128xbf16, #tpu.memory_space<vmem>>, %arg10: memref<1x128xf32, #tpu.memory_space<vmem>>, %arg11: memref<1x128xf32, #tpu.memory_space<vmem>>, %arg12: memref<1x1xf32, #tpu.memory_space<vmem>>, %arg13: memref<8x1xf32, #tpu.memory_space<vmem>>) attributes {dimension_semantics = [#tpu.dimension_semantics<parallel>], iteration_bounds = array<i64: 1>, scalar_prefetch = 0 : i64, scratch_operands = 0 : i64, tpu.core_type = #tpu.core_type<tc>, window_params = [{transform_indices = @transform_0, window_bounds = array<i64: 8, 16>}, {transform_indices = @transform_1, window_bounds = array<i64: 8, 4>}, {pipeline_mode = #tpu.pipeline_mode<synchronous>, transform_indices = @transform_2, window_bounds = array<i64: 16, 256>}, {pipeline_mode = #tpu.pipeline_mode<synchronous>, transform_indices = @transform_3, window_bounds = array<i64: 1, 256>}, {pipeline_mode = #tpu.pipeline_mode<synchronous>, transform_indices = @transform_4, window_bounds = array<i64: 4, 128>}, {pipeline_mode = #tpu.pipeline_mode<synchronous>, transform_indices = @transform_5, window_bounds = array<i64: 1, 128>}, {pipeline_mode = #tpu.pipeline_mode<synchronous>, transform_indices = @transform_6, window_bounds = array<i64: 256, 128>}, {pipeline_mode = #tpu.pipeline_mode<synchronous>, transform_indices = @transform_7, window_bounds = array<i64: 1, 128>}, {pipeline_mode = #tpu.pipeline_mode<synchronous>, transform_indices = @transform_8, window_bounds = array<i64: 256, 128>}, {pipeline_mode = #tpu.pipeline_mode<synchronous>, transform_indices = @transform_9, window_bounds = array<i64: 1, 128>}, {pipeline_mode = #tpu.pipeline_mode<synchronous>, transform_indices = @transform_10, window_bounds = array<i64: 1, 128>}, {pipeline_mode = #tpu.pipeline_mode<synchronous>, transform_indices = @transform_11, window_bounds = array<i64: 1, 1>}, {transform_indices = @transform_12, window_bounds = array<i64: 8, 1>}]} {
    %c0 = arith.constant 0 : index
    %c0_0 = arith.constant 0 : index
    %0 = vector.load %arg1[%c0, %c0_0] : memref<8x16xf32, #tpu.memory_space<vmem>>, vector<8x16xf32>
    %1 = arith.truncf %0 : vector<8x16xf32> to vector<8x16xbf16>
    %c0_1 = arith.constant 0 : index
    %c0_2 = arith.constant 0 : index
    %2 = vector.load %arg3[%c0_1, %c0_2] : memref<16x256xbf16, #tpu.memory_space<vmem>>, vector<16x256xbf16>
    %cst = arith.constant dense<0.000000e+00> : vector<8x256xf32>
    %3 = tpu.matmul %1, %2, %cst {dimension_numbers = #tpu.dot_dimension_numbers<[1], [0], [0], [1], [0, 0, 1, 1], [], []>} : vector<8x16xbf16>, vector<16x256xbf16>, vector<8x256xf32> -> vector<8x256xf32>
    %c0_3 = arith.constant 0 : index
    %c0_4 = arith.constant 0 : index
    %4 = vector.load %arg4[%c0_3, %c0_4] : memref<1x256xf32, #tpu.memory_space<vmem>>, vector<1x256xf32>
    %5 = vector.broadcast %4 : vector<1x256xf32> to vector<8x256xf32>
    %6 = arith.addf %3, %5 : vector<8x256xf32>
    %cst_5 = arith.constant 0.000000e+00 : f32
    %7 = vector.broadcast %cst_5 : f32 to vector<8x256xf32>
    %8 = arith.maximumf %6, %7 : vector<8x256xf32>
    %c0_6 = arith.constant 0 : index
    %c0_7 = arith.constant 0 : index
    %9 = vector.load %arg2[%c0_6, %c0_7] : memref<8x4xf32, #tpu.memory_space<vmem>>, vector<8x4xf32>
    %10 = arith.truncf %9 : vector<8x4xf32> to vector<8x4xbf16>
    %c0_8 = arith.constant 0 : index
    %c0_9 = arith.constant 0 : index
    %11 = vector.load %arg5[%c0_8, %c0_9] : memref<4x128xbf16, #tpu.memory_space<vmem>>, vector<4x128xbf16>
    %cst_10 = arith.constant dense<0.000000e+00> : vector<8x128xf32>
    %12 = tpu.matmul %10, %11, %cst_10 {dimension_numbers = #tpu.dot_dimension_numbers<[1], [0], [0], [1], [0, 0, 1, 1], [], []>} : vector<8x4xbf16>, vector<4x128xbf16>, vector<8x128xf32> -> vector<8x128xf32>
    %c0_11 = arith.constant 0 : index
    %c0_12 = arith.constant 0 : index
    %13 = vector.load %arg6[%c0_11, %c0_12] : memref<1x128xf32, #tpu.memory_space<vmem>>, vector<1x128xf32>
    %14 = vector.broadcast %13 : vector<1x128xf32> to vector<8x128xf32>
    %15 = arith.addf %12, %14 : vector<8x128xf32>
    %cst_13 = arith.constant 0.000000e+00 : f32
    %16 = vector.broadcast %cst_13 : f32 to vector<8x128xf32>
    %17 = arith.maximumf %15, %16 : vector<8x128xf32>
    %18 = arith.truncf %8 : vector<8x256xf32> to vector<8x256xbf16>
    %c0_14 = arith.constant 0 : index
    %c0_15 = arith.constant 0 : index
    %19 = vector.load %arg7[%c0_14, %c0_15] : memref<256x128xbf16, #tpu.memory_space<vmem>>, vector<256x128xbf16>
    %cst_16 = arith.constant dense<0.000000e+00> : vector<8x128xf32>
    %20 = tpu.matmul %18, %19, %cst_16 {dimension_numbers = #tpu.dot_dimension_numbers<[1], [0], [0], [1], [0, 0, 1, 1], [], []>} : vector<8x256xbf16>, vector<256x128xbf16>, vector<8x128xf32> -> vector<8x128xf32>
    %c0_17 = arith.constant 0 : index
    %c0_18 = arith.constant 0 : index
    %21 = vector.load %arg8[%c0_17, %c0_18] : memref<1x128xf32, #tpu.memory_space<vmem>>, vector<1x128xf32>
    %22 = vector.broadcast %21 : vector<1x128xf32> to vector<8x128xf32>
    %23 = arith.addf %20, %22 : vector<8x128xf32>
    %cst_19 = arith.constant 0.000000e+00 : f32
    %24 = vector.broadcast %cst_19 : f32 to vector<8x128xf32>
    %25 = arith.maximumf %23, %24 : vector<8x128xf32>
    %26 = arith.truncf %25 : vector<8x128xf32> to vector<8x128xbf16>
    %27 = arith.truncf %17 : vector<8x128xf32> to vector<8x128xbf16>
    %28 = tpu.concatenate %26, %27 in 1 : vector<8x128xbf16>, vector<8x128xbf16> -> vector<8x256xbf16>
    %c0_20 = arith.constant 0 : index
    %c0_21 = arith.constant 0 : index
    %29 = vector.load %arg9[%c0_20, %c0_21] : memref<256x128xbf16, #tpu.memory_space<vmem>>, vector<256x128xbf16>
    %cst_22 = arith.constant dense<0.000000e+00> : vector<8x128xf32>
    %30 = tpu.matmul %28, %29, %cst_22 {dimension_numbers = #tpu.dot_dimension_numbers<[1], [0], [0], [1], [0, 0, 1, 1], [], []>} : vector<8x256xbf16>, vector<256x128xbf16>, vector<8x128xf32> -> vector<8x128xf32>
    %c0_23 = arith.constant 0 : index
    %c0_24 = arith.constant 0 : index
    %31 = vector.load %arg10[%c0_23, %c0_24] : memref<1x128xf32, #tpu.memory_space<vmem>>, vector<1x128xf32>
    %32 = vector.broadcast %31 : vector<1x128xf32> to vector<8x128xf32>
    %33 = arith.addf %30, %32 : vector<8x128xf32>
    %cst_25 = arith.constant 0.000000e+00 : f32
    %34 = vector.broadcast %cst_25 : f32 to vector<8x128xf32>
    %35 = arith.maximumf %33, %34 : vector<8x128xf32>
    %c0_26 = arith.constant 0 : index
    %c0_27 = arith.constant 0 : index
    %36 = vector.load %arg11[%c0_26, %c0_27] : memref<1x128xf32, #tpu.memory_space<vmem>>, vector<1x128xf32>
    %37 = vector.broadcast %36 : vector<1x128xf32> to vector<8x128xf32>
    %38 = arith.mulf %35, %37 : vector<8x128xf32>
    %cst_28 = arith.constant dense<0.000000e+00> : vector<8xf32>
    %39 = vector.multi_reduction <add>, %38, %cst_28 [1] : vector<8x128xf32> to vector<8xf32>
    %40 = vector.shape_cast %39 : vector<8xf32> to vector<8x1xf32>
    %c0_29 = arith.constant 0 : index
    %c0_30 = arith.constant 0 : index
    %41 = vector.load %arg12[%c0_29, %c0_30] : memref<1x1xf32, #tpu.memory_space<vmem>>, vector<1x1xf32>
    %42 = vector.broadcast %41 : vector<1x1xf32> to vector<8x1xf32>
    %43 = arith.addf %40, %42 : vector<8x1xf32>
    %c0_31 = arith.constant 0 : index
    %c0_32 = arith.constant 0 : index
    %44 = vector.load %arg13[%c0_31, %c0_32] : memref<8x1xf32, #tpu.memory_space<vmem>>, vector<8x1xf32>
    tpu.vector_store %arg13[%c0_31, %c0_32], %43 {strides = array<i32>} : memref<8x1xf32, #tpu.memory_space<vmem>>, vector<8x1xf32>,
    return
  }
  func.func @transform_0(%arg0: i32) -> (i32, i32) {
    %c0_i32 = arith.constant 0 : i32
    %c0_i32_0 = arith.constant 0 : i32
    return %arg0, %c0_i32 : i32, i32
  }
  func.func @transform_1(%arg0: i32) -> (i32, i32) {
    %c0_i32 = arith.constant 0 : i32
    %c0_i32_0 = arith.constant 0 : i32
    return %arg0, %c0_i32 : i32, i32
  }
  func.func @transform_2(%arg0: i32) -> (i32, i32) {
    %c0_i32 = arith.constant 0 : i32
    %c0_i32_0 = arith.constant 0 : i32
    %c0_i32_1 = arith.constant 0 : i32
    return %c0_i32, %c0_i32_0 : i32, i32
  }
  func.func @transform_3(%arg0: i32) -> (i32, i32) {
    %c0_i32 = arith.constant 0 : i32
    %c0_i32_0 = arith.constant 0 : i32
    %c0_i32_1 = arith.constant 0 : i32
    return %c0_i32, %c0_i32_0 : i32, i32
  }
  func.func @transform_4(%arg0: i32) -> (i32, i32) {
    %c0_i32 = arith.constant 0 : i32
    %c0_i32_0 = arith.constant 0 : i32
    %c0_i32_1 = arith.constant 0 : i32
    return %c0_i32, %c0_i32_0 : i32, i32
  }
  func.func @transform_5(%arg0: i32) -> (i32, i32) {
    %c0_i32 = arith.constant 0 : i32
    %c0_i32_0 = arith.constant 0 : i32
    %c0_i32_1 = arith.constant 0 : i32
    return %c0_i32, %c0_i32_0 : i32, i32
  }
  func.func @transform_6(%arg0: i32) -> (i32, i32) {
    %c0_i32 = arith.constant 0 : i32
    %c0_i32_0 = arith.constant 0 : i32
    %c0_i32_1 = arith.constant 0 : i32
    return %c0_i32, %c0_i32_0 : i32, i32
  }
  func.func @transform_7(%arg0: i32) -> (i32, i32) {
    %c0_i32 = arith.constant 0 : i32
    %c0_i32_0 = arith.constant 0 : i32
    %c0_i32_1 = arith.constant 0 : i32
    return %c0_i32, %c0_i32_0 : i32, i32
  }
  func.func @transform_8(%arg0: i32) -> (i32, i32) {
    %c0_i32 = arith.constant 0 : i32
    %c0_i32_0 = arith.constant 0 : i32
    %c0_i32_1 = arith.constant 0 : i32
    return %c0_i32, %c0_i32_0 : i32, i32
  }
  func.func @transform_9(%arg0: i32) -> (i32, i32) {
    %c0_i32 = arith.constant 0 : i32
    %c0_i32_0 = arith.constant 0 : i32
    %c0_i32_1 = arith.constant 0 : i32
    return %c0_i32, %c0_i32_0 : i32, i32
  }
  func.func @transform_10(%arg0: i32) -> (i32, i32) {
    %c0_i32 = arith.constant 0 : i32
    %c0_i32_0 = arith.constant 0 : i32
    %c0_i32_1 = arith.constant 0 : i32
    return %c0_i32, %c0_i32_0 : i32, i32
  }
  func.func @transform_11(%arg0: i32) -> (i32, i32) {
    %c0_i32 = arith.constant 0 : i32
    %c0_i32_0 = arith.constant 0 : i32
    %c0_i32_1 = arith.constant 0 : i32
    return %c0_i32, %c0_i32_0 : i32, i32
  }
  func.func @transform_12(%arg0: i32) -> (i32, i32) {
    %c0_i32 = arith.constant 0 : i32
    %c0_i32_0 = arith.constant 0 : i32
    return %arg0, %c0_i32 : i32, i32
  }
}

</mosaic_0001>

<bundles_post_ra>
// kernel: tpu_custom_call.1
= control target key start
LH: loop header
LB: loop body
LE: loop exit
PB: predicated region body
PF: predicated region fallthrough
CT: control target
= control target key end

     0   :  { %s951_s0 = inlined_call_operand.hbm [shape: f32[8,16], index: 0, kind: input, shape index: {}]   ;;  %s952_s1 = inlined_call_operand.vmem [shape: f32[8,4], index: 1, kind: input, shape index: {}]   ;;  %s953_s2 = inlined_call_operand.vmem [shape: bf16[16,256], index: 2, kind: input, shape index: {}]   ;;  %s954_s3 = inlined_call_operand.vmem [shape: f32[1,256], index: 3, kind: input, shape index: {}]   ;;  %s955_s4 = inlined_call_operand.vmem [shape: bf16[4,128], index: 4, kind: input, shape index: {}]   ;;  %s956_s5 = inlined_call_operand.vmem [shape: f32[1,128], index: 5, kind: input, shape index: {}]   ;;  %s957_s6 = inlined_call_operand.hbm [shape: bf16[256,128], index: 6, kind: input, shape index: {}]   ;;  %s958_s7 = inlined_call_operand.vmem [shape: f32[1,128], index: 7, kind: input, shape index: {}]   ;;  %s959_s8 = inlined_call_operand.hbm [shape: bf16[256,128], index: 8, kind: input, shape index: {}]   ;;  %s960_s9 = inlined_call_operand.vmem [shape: f32[1,128], index: 9, kind: input, shape index: {}]   ;;  %s961_s10 = inlined_call_operand.vmem [shape: f32[1,128], index: 10, kind: input, shape index: {}]   ;;  %s962_s11 = inlined_call_operand.<no memory space> [shape: f32[1,1], index: 11, kind: input, shape index: {}]   ;;  %s963_s12 = inlined_call_operand.vmem [shape: f32[8,1], index: 12, kind: output, shape index: {}]  }
   0x1   :  { %v17_v0 = vstv %s962_s11 }
   0x2   :  { %18 = vst [vmem:[#allocation2] sm:$0x1] %v17_v0 }
   0x3   :  { %19 = vsyncpa [#allocation4], 0 }
   0x4   :  { %20 = vsyncpa [#allocation6], 0  ;;  %s803_s23 = smov [#allocation5]   ;;  %s733_s27 = scalar_lea.hbm %s957_s6, 2048 }
   0x5   :  { %s46_s24 = sshll.u32 %s803_s23, 4  ;;  %p734_p0 = scmp.ne.s32.totalorder %s957_s6, %s733_s27  ;;  %s47_s24 = int_to_ptr.vmem [resolvable:$true] %s46_s24 }
   0x6   :  { %p737_p1 = scmp.lt.u32.totalorder %s733_s27, %s957_s6 }
   0x8   :  { %p739_p2 = pnand %p737_p1, %p734_p0 }
   0xa   :  { %742 = shalt.err (!%p739_p2)
}
   0xb   :  { %s743_s11 = scalar_lea.vmem %s47_s24, 2048  ;;  %p748_p4 = scmp.lt.s32.totalorder %s47_s24, %s47_s24 }
   0xc   :  { %p744_p3 = scmp.ne.s32.totalorder %s47_s24, %s743_s11  ;;  %p749_p5 = scmp.lt.s32.totalorder %s743_s11, %s743_s11 }
   0xe   :  { %p750_p6 = por %p749_p5, %p748_p4 }
  0x10   :  { %p751_p7 = pnand %p750_p6, %p744_p3 }
  0x12   :  { %754 = shalt.err (!%p751_p7)
}
  0x13   :  { %s804_s14 = smov 64   ;;  %s805_s15 = smov 4  }
  0x14   :  { %52 = dma.hbm_to_vmem [thread:$0]  %s957_s6, 2048, %s47_s24, [#allocation6], %s804_s14, %s804_s14, %s805_s15  }
  0x15   :  { %s806_s18 = smov [#allocation3]   ;;  %s807_s20 = smov [#allocation7]  }
  0x16   :  { %s27_s19 = sshll.u32 %s806_s18, 4  ;;  %s60_s21 = sshll.u32 %s807_s20, 4  ;;  %s28_s19 = int_to_ptr.vmem [resolvable:$true] %s27_s19  ;;  %s61_s21 = int_to_ptr.vmem [resolvable:$true] %s60_s21 }
  0x17   :  { %s755_s25 = scalar_lea.hbm %s951_s0, 128 }
  0x18   :  { %p756_p8 = scmp.ne.s32.totalorder %s951_s0, %s755_s25  ;;  %p759_p9 = scmp.lt.u32.totalorder %s755_s25, %s951_s0 }
  0x1a   :  { %p761_p10 = pnand %p759_p9, %p756_p8 }
  0x1c   :  { %764 = shalt.err (!%p761_p10)
}
  0x1d   :  { %s765_s6 = scalar_lea.vmem %s28_s19, 128  ;;  %p770_p12 = scmp.lt.s32.totalorder %s28_s19, %s28_s19 }
  0x1e   :  { %p766_p11 = scmp.ne.s32.totalorder %s28_s19, %s765_s6  ;;  %p771_p13 = scmp.lt.s32.totalorder %s765_s6, %s765_s6 }
  0x20   :  { %p772_p0 = por %p771_p13, %p770_p12 }
  0x22   :  { %p773_p1 = pnand %p772_p0, %p766_p11 }
  0x24   :  { %776 = shalt.err (!%p773_p1)
}
  0x25   :  { %30 = dma.hbm_to_vmem [thread:$0]  %s951_s0, 128, %s28_s19, [#allocation4]  }
  0x26   :  { %s777_s16 = scalar_lea.hbm %s959_s8, 2048 }
  0x27   :  { %p778_p2 = scmp.ne.s32.totalorder %s959_s8, %s777_s16  ;;  %p781_p3 = scmp.lt.u32.totalorder %s777_s16, %s959_s8 }
  0x29   :  { %p783_p4 = pnand %p781_p3, %p778_p2 }
  0x2b   :  { %786 = shalt.err (!%p783_p4)
}
  0x2c   :  { %s787_s23 = scalar_lea.vmem %s61_s21, 2048  ;;  %p792_p6 = scmp.lt.s32.totalorder %s61_s21, %s61_s21 }
  0x2d   :  { %p788_p5 = scmp.ne.s32.totalorder %s61_s21, %s787_s23  ;;  %p793_p7 = scmp.lt.s32.totalorder %s787_s23, %s787_s23 }
  0x2f   :  { %p794_p8 = por %p793_p7, %p792_p6 }
  0x31   :  { %p795_p9 = pnand %p794_p8, %p788_p5 }
  0x33   :  { %798 = shalt.err (!%p795_p9)
}
  0x34   :  { %66 = dma.hbm_to_vmem [thread:$0]  %s959_s8, 2048, %s61_s21, [#allocation6], %s804_s14, %s804_s14, %s805_s15  }
  0x35   :  { %799 = dma.done.wait [#allocation4], 128  }
  0x36   :  { %800 = vsyncadd [#allocation4], 4294967168 }
  0x37   :  { %801 = dma.done.wait [#allocation6], 4096  }
  0x38   :  { %802 = vsyncadd [#allocation6], 4294963200  ;;  %v808_v1 = vmov 0   ;;  %v698_v2 = vld [vmem:[%s953_s2 + $0x4] ss:$8 sps:$4 sm:$0xff]   ;;  %vm109_vm0 = vcmask 130048   ;;  %v89_v39 = vlaneseq }
  0x39   :  { %145 = vmatprep.mubr.bf16.mxu0 %v808_v1  ;;  %v700_v3 = vld [vmem:[%s953_s2] ss:$8 sps:$4 sm:$0xff]   ;;  %113 = vmatprep.subr.bf16.mxu0 %v698_v2  ;;  %v703_v8 = vld [vmem:[#allocation5 + $0x48] sm:$0xff]   ;;  %vm170_vm1 = vcmask 1041408   ;;  %v809_v22 = vmov 0.0   ;;  %vm166_vm2 = vcmask 31744  }
  0x3a   :  { %v83_v4 = vld [vmem:[#allocation3] sm:$0xff]  ;;  %v701_v6 = vld [vmem:[#allocation5 + $0x40] sm:$0xff]   ;;  %114 = vmatpush1.bf16.msra.mxu0 %v700_v3  ;;  %v704_v9 = vld [vmem:[#allocation5 + $0x8] sm:$0xff]   ;;  %684 = vmatprep.subr.bf16.mxu1 %v809_v22  ;;  %vm810_vm3 = vmmov 0   ;;  %v90_v40 = vshrl.u32 %v89_v39, 7  ;;  %vm589_vm4 = vcmask 7168  }
  0x3b   :  { %v84_v5 = vpack.c.bf16 %v83_v4, %v83_v4  ;;  %v702_v7 = vld [vmem:[#allocation5] sm:$0xff]   ;;  %640 = vmatprep.subr.bf16.mxu0 %v701_v6  ;;  %v705_v10 = vld [vmem:[#allocation5 + $0x50] sm:$0xff]   ;;  %v707_v12 = vld [vmem:[#allocation5 + $0x58] sm:$0xff]   ;;  %686 = vmatprep.mubr.msk.bf16.mxu1 %vm810_vm3, %v809_v22 }
  0x3c   :  { %v706_v11 = vld [vmem:[#allocation5 + $0x10] sm:$0xff]   ;;  %v708_v13 = vld [vmem:[#allocation5 + $0x18] sm:$0xff]   ;;  %v709_v14 = vld [vmem:[#allocation5 + $0x60] sm:$0xff]   ;;  %v91_v41 = vsub.s32 0, %v90_v40  ;;  %v95_v43 = vsub.s32 1, %v90_v40 }
  0x3d   :  { %599 = vmatmul.mubr.msk.bf16.vlgmr.msra.gmra.mrb[0].mxu0 %vm109_vm0, %v84_v5  ;;  %v710_v15 = vld [vmem:[#allocation5 + $0x20] sm:$0xff]   ;;  %v711_v16 = vld [vmem:[#allocation5 + $0x68] sm:$0xff]   ;;  %v713_v18 = vld [vmem:[#allocation5 + $0x70] sm:$0xff]  }
  0x3e   :  { %641 = vmatpush3.bf16.msra.mxu0 %v702_v7  ;;  %v712_v17 = vld [vmem:[#allocation5 + $0x28] sm:$0xff]   ;;  %v714_v19 = vld [vmem:[#allocation5 + $0x30] sm:$0xff]   ;;  %v715_v21 = vld [vmem:[#allocation5 + $0x78] sm:$0xff]  }
  0x3f   :  { %642 = vmatprep.subr.bf16.mxu0 %v703_v8  ;;  %v158_v20 = vld [vmem:[%s955_s4] sm:$0x3]  ;;  %v717_v27 = vld [vmem:[#allocation7 + $0x40] sm:$0xff]   ;;  %v719_v29 = vld [vmem:[#allocation7 + $0x48] sm:$0xff]  }
  0x40   :  { %v172_v23 = vsel %vm170_vm1, %v158_v20, 0  ;;  %v716_v24 = vld [vmem:[#allocation5 + $0x38] sm:$0xff]   ;;  %v718_v28 = vld [vmem:[#allocation7] sm:$0xff]   ;;  %v720_v30 = vld [vmem:[#allocation7 + $0x8] sm:$0xff]  }
  0x41   :  { %685 = vmatpush3.bf16.msra.mxu1 %v172_v23  ;;  %v156_v25 = vld [vmem:[%s952_s1] sm:$0xff]  ;;  %v725_v35 = vld [vmem:[#allocation7 + $0x60] sm:$0xff]   ;;  %v727_v37 = vld [vmem:[#allocation7 + $0x68] sm:$0xff]  }
  0x42   :  { %643 = vmatpush3.bf16.msra.mxu0 %v704_v9  ;;  %v157_v26 = vpack.c.bf16 %v156_v25, %v156_v25  ;;  %662 = vmatprep.subr.bf16.mxu1 %v717_v27  ;;  %v721_v31 = vld [vmem:[#allocation7 + $0x50] sm:$0xff]   ;;  %v723_v33 = vld [vmem:[#allocation7 + $0x58] sm:$0xff]   ;;  %v726_v36 = vld [vmem:[#allocation7 + $0x20] sm:$0xff]  }
  0x43   :  { %644 = vmatprep.subr.bf16.mxu0 %v705_v10  ;;  %v722_v32 = vld [vmem:[#allocation7 + $0x10] sm:$0xff]   ;;  %v724_v34 = vld [vmem:[#allocation7 + $0x18] sm:$0xff]   ;;  %v728_v38 = vld [vmem:[#allocation7 + $0x28] sm:$0xff]  }
  0x44   :  { %687 = vmatmul.mubr.msk.bf16.vlgmr.msra.gmra.mrb[0].mxu1 %vm166_vm2, %v157_v26  ;;  %v87_v42 = vld [vmem:[%s954_s3] sm:$0x3] }
  0x45   :  { %663 = vmatpush3.bf16.msra.mxu1 %v718_v28  ;;  %v92_v44 = vrot.slane %v87_v42, %v91_v41  ;;  %v96_v45 = vrot.slane %v87_v42, %v95_v43  ;;  %v600_v56 = vld [vmem:[%s956_s5] ss:$0 sm:$0xff]  ;;  %v731_v2 = vld [vmem:[#allocation7 + $0x78] sm:$0xff]  }
  0x46   :  { %645 = vmatpush3.bf16.msra.mxu0 %v706_v11  ;;  %664 = vmatprep.subr.bf16.mxu1 %v719_v29  ;;  %v729_v60 = vld [vmem:[#allocation7 + $0x70] sm:$0xff]   ;;  %v732_v3 = vld [vmem:[#allocation7 + $0x38] sm:$0xff]  }
  0x47   :  { %646 = vmatprep.subr.bf16.mxu0 %v707_v12  ;;  %v730_v62 = vld [vmem:[#allocation7 + $0x30] sm:$0xff]  }
  0x48   :  { %v602_v5 = vld [vmem:[%s958_s7] ss:$0 sm:$0xff] }
  0x49   :  { %665 = vmatpush3.bf16.msra.mxu1 %v720_v30  ;;  %v636_v20 = vld [vmem:[%s961_s10] ss:$0 sm:$0xff] }
  0x4a   :  { %647 = vmatpush3.bf16.msra.mxu0 %v708_v13  ;;  %666 = vmatprep.subr.bf16.mxu1 %v721_v31  ;;  %v637_v23 = vld [vmem:[#allocation2] ss:$0 sm:$0xff] }
  0x4b   :  { %648 = vmatprep.subr.bf16.mxu0 %v709_v14 }
  0x4d   :  { %667 = vmatpush3.bf16.msra.mxu1 %v722_v32 }
  0x4e   :  { %649 = vmatpush3.bf16.msra.mxu0 %v710_v15  ;;  %668 = vmatprep.subr.bf16.mxu1 %v723_v33  ;;  %v619_v15 = vld [vmem:[%s960_s9] ss:$0 sm:$0xff] }
  0x4f   :  { %650 = vmatprep.subr.bf16.mxu0 %v711_v16 }
  0x51   :  { %669 = vmatpush3.bf16.msra.mxu1 %v724_v34 }
  0x52   :  { %651 = vmatpush3.bf16.msra.mxu0 %v712_v17  ;;  %670 = vmatprep.subr.bf16.mxu1 %v725_v35 }
  0x53   :  { %652 = vmatprep.subr.bf16.mxu0 %v713_v18 }
  0x55   :  { %671 = vmatpush3.bf16.msra.mxu1 %v726_v36 }
  0x56   :  { %653 = vmatpush3.bf16.msra.mxu0 %v714_v19  ;;  %672 = vmatprep.subr.bf16.mxu1 %v727_v37 }
  0x57   :  { %654 = vmatprep.subr.bf16.mxu0 %v715_v21 }
  0x59   :  { %673 = vmatpush3.bf16.msra.mxu1 %v728_v38 }
  0x5a   :  { %655 = vmatpush3.bf16.msra.mxu0 %v716_v24  ;;  %674 = vmatprep.subr.bf16.mxu1 %v729_v60 }
  0x5d   :  { %675 = vmatpush3.bf16.msra.mxu1 %v730_v62 }
  0x5e   :  { %676 = vmatprep.subr.bf16.mxu1 %v731_v2 }
  0x61   :  { %677 = vmatpush3.bf16.msra.mxu1 %v732_v3 }
 0x110   :  { %v147_v46 = vpop.f32.mrb[0].mxu0 }
 0x111   :  { %v148_v47 = vadd.f32 %v147_v46, %v92_v44  ;;  %v149_v48 = vpop.f32.mrb[1].mxu0 }
 0x112   :  { %v150_v49 = vadd.f32 %v149_v48, %v96_v45  ;;  %v151_v50 = vpop.f32.mrb[2].mxu0 }
 0x113   :  { %v154_v51 = vmax.f32 %v148_v47, 0.0  ;;  %v152_v52 = vpop.f32.mrb[3].mxu0 }
 0x114   :  { %v155_v53 = vmax.f32 %v150_v49, 0.0 }
 0x115   :  { %v215_v55 = vpack.c.bf16 %v154_v51, %v154_v51 }
 0x116   :  { %v216_v54 = vpack.c.bf16 %v155_v53, %v155_v53 }
 0x117   :  { %v208_v57 = vpop.f32.mrb[0].mxu1 }
 0x118   :  { %384 = vmatprep.mubr.bf16.mxu0 %v216_v54  ;;  %v209_v58 = vadd.f32 %v600_v56, %v208_v57  ;;  %v688_v59 = vpop.f32.mrb[1].mxu1 }
 0x119   :  { %385 = vmatmul.mubr.bf16.vlgmr.msra.gmra.mrb[4].mxu0 %v215_v55  ;;  %v211_v61 = vpop.f32.mrb[2].mxu1 }
 0x11a   :  { %v214_v63 = vmax.f32 %v209_v58, 0.0  ;;  %v689_v0 = vpop.f32.mrb[3].mxu1 }
 0x11c   :  { %v394_v1 = vpack.c.bf16 %v214_v63, %v214_v63 }
 0x11e   :  { %562 = vmatprep.mubr.bf16.mxu1 %v394_v1 }
 0x1ec   :  { %v656_v4 = vpop.f32.mrb[4].mxu0 }
 0x1ed   :  { %v657_v6 = vpop.f32.mrb[5].mxu0 }
 0x1ee   :  { %v658_v7 = vadd.f32 %v657_v6, %v656_v4  ;;  %v659_v8 = vpop.f32.mrb[6].mxu0 }
 0x1ef   :  { %v660_v9 = vpop.f32.mrb[7].mxu0 }
 0x1f0   :  { %v387_v10 = vadd.f32 %v658_v7, %v602_v5 }
 0x1f2   :  { %v392_v11 = vmax.f32 %v387_v10, 0.0 }
 0x1f4   :  { %v393_v12 = vpack.c.bf16 %v392_v11, %v392_v11 }
 0x1f6   :  { %563 = vmatmul.mubr.bf16.vlgmr.msra.gmra.mrb[4].mxu1 %v393_v12 }
 0x2c9   :  { %v678_v13 = vpop.f32.mrb[4].mxu1 }
 0x2ca   :  { %v679_v14 = vpop.f32.mrb[5].mxu1 }
 0x2cb   :  { %v680_v16 = vadd.f32 %v679_v14, %v678_v13  ;;  %v681_v17 = vpop.f32.mrb[6].mxu1 }
 0x2cc   :  { %v682_v18 = vpop.f32.mrb[7].mxu1 }
 0x2cd   :  { %v565_v19 = vadd.f32 %v680_v16, %v619_v15 }
 0x2cf   :  { %v570_v21 = vmax.f32 %v565_v19, 0.0 }
 0x2d1   :  { %v578_v22 = vmul.f32 %v636_v20, %v570_v21 }
 0x2d3   :  { %579 = vadd.xlane.f32.xlu0 %v578_v22 }
 0x360   :  { %v580_v24 = vpop.xlane.xlu0 %579 }
 0x361   :  { %v588_v25 = vadd.f32 %v637_v23, %v580_v24 }
 0x363   :  { %590 = vst.msk [vmem:[%s963_s12] sm:$0xff] %vm589_vm4, %v588_v25 }
 0x364   :  { %595 = vsyncpa [#allocation4], 1 }
 0x365   :  { %596 = vsyncpa [#allocation6], 1 }

</bundles_post_ra>
